<compile_context>
chip_gen: v6e
topology: v6e:2x2x1
jax: 0.10.0
libtpu: 0.0.40
codegen_flags: <defaults>
</compile_context>

<pallas_src>
import jax
import jax.numpy as jnp
from jax.experimental import pallas as pl
from jax.experimental.pallas import tpu as pltpu

_VMEM_BUDGET = 48 * 1024 * 1024  # conservative across v5e/v6e (128 MiB) and v7x (64 MiB)


def gaussian_kernel(x_ref, w_ref, b_ref, eps_ref, out_ref, acc_ref):
    k = pl.program_id(1)

    @pl.when(k == 0)
    def _init():
        acc_ref[...] = jnp.zeros_like(acc_ref)

    # Fused MXU matmul over the current K tile, f32 accumulation.
    acc_ref[...] += jnp.dot(x_ref[...], w_ref[...],
                            preferred_element_type=jnp.float32)

    @pl.when(k == pl.num_programs(1) - 1)
    def _epilogue():
        logits = acc_ref[...] + b_ref[...].astype(jnp.float32)
        out_dim = logits.shape[-1] // 2
        mean = logits[:, :out_dim]          # in-vreg select (sub-128 split)
        logvar = logits[:, out_dim:]
        std = jnp.exp(0.5 * logvar)         # EUP transcendental, f32 (v5e VPU has no bf16)
        z = mean + eps_ref[...].astype(jnp.float32) * std
        # Single packed store: one lane-denser output stream instead of three.
        out_ref[...] = jnp.concatenate([z, mean, logvar], axis=-1).astype(out_ref.dtype)


def _spec(shape, index_map, buffered=None):
    """BlockSpec with optional explicit buffer depth (graceful fallback)."""
    if buffered is None:
        return pl.BlockSpec(shape, index_map)
    try:
        return pl.BlockSpec(shape, index_map, pipeline_mode=pl.Buffered(buffered))
    except Exception:  # older/newer API without pipeline_mode: default buffering
        return pl.BlockSpec(shape, index_map)


def _choose_k_tile(in_dim, cap):
    """K tile: full K if small, else a multiple of 128 that divides in_dim."""
    if in_dim <= cap:
        return in_dim
    for tk in range((cap // 128) * 128, 0, -128):
        if in_dim % tk == 0:
            return tk
    return in_dim  # fallback: no clean divisor, keep K whole


def _choose_tb(B, per_row, fixed, budget, cap):
    """Largest multiple-of-8 batch tile fitting the VMEM budget (>=2 steps for big B)."""
    avail = max(budget - fixed, per_row * 8)
    tb_max = max(8, min(cap, (avail // per_row) // 8 * 8))
    if B <= tb_max:
        if B > 256:
            # Force >= 2 batch grid steps so the "parallel" axis shards across
            # both TensorCores on v7x (one extra ~0.35us grid step is cheap).
            half = -(-B // 2)
            return min(tb_max, -(-half // 8) * 8)
        return B          # full batch in one tile (block == full array dim is legal)
    return tb_max


def gaussian_forward(x, w, b, eps, *, compute_dtype=None, tile_b=1024,
                     k_tile_cap=1024, vmem_budget=_VMEM_BUDGET,
                     force_pallas=False):
    """x: (B, in_dim), w: (in_dim, 2*out_dim), b: (1, 2*out_dim), eps: (B, out_dim)."""
    B, in_dim = x.shape
    two_out = w.shape[1]
    assert two_out % 2 == 0, "weight must have an even number of output columns"
    out_dim = two_out // 2
    out_dtype = x.dtype

    # Tiny-problem fast path: custom-call dispatch + per-step overhead dominate;
    # a plain XLA fusion is strictly faster at these sizes.
    if not force_pallas and B * two_out < 16384:
        logits = (x @ w + b).astype(jnp.float32)
        mean, logvar = logits[:, :out_dim], logits[:, out_dim:]
        z = mean + eps.astype(jnp.float32) * jnp.exp(0.5 * logvar)
        return (z.astype(out_dtype), mean.astype(out_dtype), logvar.astype(out_dtype))

    # Optional low-precision operand cast (bandwidth win on v6e/v7x).  The f32
    # accumulator, exp epilogue and all outputs keep full precision.
    cdt = jnp.dtype(compute_dtype) if compute_dtype is not None else jnp.dtype(x.dtype)
    xk = x.astype(cdt)
    wk = w.astype(cdt)
    epsk = eps.astype(cdt)
    bk = b.astype(jnp.float32)

    isz = cdt.itemsize
    osz = jnp.dtype(out_dtype).itemsize

    # --- Tiling derived from an explicit VMEM budget ------------------------
    tk = _choose_k_tile(in_dim, k_tile_cap)
    nk = in_dim // tk if in_dim % tk == 0 else 1
    w_bufs = 2 if nk > 1 else 1      # weights are grid-invariant only if K untiled

    fixed = w_bufs * tk * two_out * isz + two_out * 4            # weights + bias
    per_row = (2 * tk * isz                                      # x (double-buffered)
               + 2 * out_dim * isz                               # eps
               + 2 * 3 * out_dim * osz                           # packed output
               + two_out * 4)                                    # f32 accumulator
    tb = _choose_tb(B, per_row, fixed, vmem_budget, tile_b)
    nb = -(-B // tb)
    grid = (nb, nk)

    need = fixed + tb * per_row
    vmem_limit = int(min(vmem_budget + (8 << 20), max(16 << 20, need + (4 << 20))))

    cost = pl.CostEstimate(
        flops=2 * B * in_dim * two_out,
        transcendentals=B * out_dim,
        bytes_accessed=int((xk.size + wk.size + epsk.size) * isz
                           + bk.size * 4 + B * 3 * out_dim * osz),
    )

    packed = pl.pallas_call(
        gaussian_kernel,
        out_shape=jax.ShapeDtypeStruct((B, 3 * out_dim), out_dtype),
        grid=grid,
        in_specs=[
            pl.BlockSpec((tb, tk), lambda i, k: (i, k)),                  # x tile
            _spec((tk, two_out), lambda i, k: (k, 0), buffered=w_bufs),   # W (fused halves)
            _spec((1, two_out), lambda i, k: (0, 0), buffered=1),         # bias (invariant)
            pl.BlockSpec((tb, out_dim), lambda i, k: (i, 0)),             # eps tile
        ],
        out_specs=pl.BlockSpec((tb, 3 * out_dim), lambda i, k: (i, 0)),   # packed z|mean|logvar
        scratch_shapes=[pltpu.VMEM((tb, two_out), jnp.float32)],          # f32 logits accumulator
        compiler_params=pltpu.CompilerParams(
            dimension_semantics=("parallel", "arbitrary"),
            vmem_limit_bytes=vmem_limit,
        ),
        cost_estimate=cost,
    )(xk, wk, bk, epsk)

    z = packed[:, :out_dim]
    mean = packed[:, out_dim:2 * out_dim]
    logvar = packed[:, 2 * out_dim:]
    return z, mean, logvar


if __name__ == "__main__":
    # Small shapes consistent with the module: Gaussian(in_dim=32, out_dim=16)
    B, in_dim, out_dim = 8, 32, 16

    key = jax.random.PRNGKey(0)
    k_x, k_w, k_b, k_eps = jax.random.split(key, 4)

    x = jax.random.normal(k_x, (B, in_dim), dtype=jnp.float32)
    bound = in_dim ** -0.5
    w = jax.random.uniform(k_w, (in_dim, 2 * out_dim), jnp.float32, -bound, bound)
    b = jax.random.uniform(k_b, (1, 2 * out_dim), jnp.float32, -bound, bound)
    eps = jax.random.normal(k_eps, (B, out_dim), dtype=jnp.float32)  # torch.randn_like

    # Pure-JAX reference.
    logits_ref = x @ w + b
    mean_ref, logvar_ref = logits_ref[:, :out_dim], logits_ref[:, out_dim:]
    z_ref = mean_ref + eps * jnp.exp(0.5 * logvar_ref)

    # Pallas path with f32 operands (bit-comparable to the reference).
    z, mean, logvar = gaussian_forward(x, w, b, eps, force_pallas=True)
    jax.block_until_ready((z, mean, logvar))
    assert jnp.allclose(mean, mean_ref, atol=1e-5)
    assert jnp.allclose(logvar, logvar_ref, atol=1e-5)
    assert jnp.allclose(z, z_ref, atol=1e-5)

    # bf16-operand bandwidth switch (epilogue/outputs stay f32): loose check.
    z16, mean16, logvar16 = gaussian_forward(
        x, w, b, eps, compute_dtype=jnp.bfloat16, force_pallas=True)
    jax.block_until_ready((z16, mean16, logvar16))
    assert jnp.allclose(mean16, mean_ref, atol=5e-2, rtol=5e-2)
    assert jnp.allclose(logvar16, logvar_ref, atol=5e-2, rtol=5e-2)
    assert jnp.allclose(z16, z_ref, atol=5e-2, rtol=5e-2)

    # Tiny-shape fast path (plain jnp dispatch) is numerically identical.
    z_fp, mean_fp, logvar_fp = gaussian_forward(x, w, b, eps)
    assert jnp.allclose(z_fp, z_ref, atol=1e-5)
    assert jnp.allclose(mean_fp, mean_ref, atol=1e-5)
    assert jnp.allclose(logvar_fp, logvar_ref, atol=1e-5)

    print("KERNEL_OK")
</pallas_src>

<mosaic_0001>
module attributes {stable_mosaic.version = 11 : i64} {
  func.func @gaussian_kernel(%arg0: i32, %arg1: i32, %arg2: memref<8x32xf32, #tpu.memory_space<vmem>>, %arg3: memref<32x32xf32, #tpu.memory_space<vmem>>, %arg4: memref<1x32xf32, #tpu.memory_space<vmem>>, %arg5: memref<8x16xf32, #tpu.memory_space<vmem>>, %arg6: memref<8x48xf32, #tpu.memory_space<vmem>>, %arg7: memref<8x32xf32, #tpu.memory_space<vmem>>) attributes {dimension_semantics = [#tpu.dimension_semantics<parallel>, #tpu.dimension_semantics<arbitrary>], iteration_bounds = array<i64: 1, 1>, scalar_prefetch = 0 : i64, scratch_operands = 1 : i64, tpu.core_type = #tpu.core_type<tc>, window_params = [{transform_indices = @transform_0, window_bounds = array<i64: 8, 32>}, {pipeline_mode = #tpu.pipeline_mode<synchronous>, transform_indices = @transform_1, window_bounds = array<i64: 32, 32>}, {pipeline_mode = #tpu.pipeline_mode<synchronous>, transform_indices = @transform_2, window_bounds = array<i64: 1, 32>}, {transform_indices = @transform_3, window_bounds = array<i64: 8, 16>}, {transform_indices = @transform_4, window_bounds = array<i64: 8, 48>}]} {
    %c0_i32 = arith.constant 0 : i32
    %0 = arith.cmpi eq, %arg1, %c0_i32 : i32
    %1 = arith.extui %0 : i1 to i32
    %c0_i32_0 = arith.constant 0 : i32
    %2 = arith.cmpi ne, %1, %c0_i32_0 : i32
    scf.if %2 {
      %cst_10 = arith.constant 0.000000e+00 : f32
      %12 = vector.broadcast %cst_10 : f32 to vector<8x32xf32>
      %c0_11 = arith.constant 0 : index
      %c0_12 = arith.constant 0 : index
      %13 = vector.load %arg7[%c0_11, %c0_12] : memref<8x32xf32, #tpu.memory_space<vmem>>, vector<8x32xf32>
      tpu.vector_store %arg7[%c0_11, %c0_12], %12 {strides = array<i32>} : memref<8x32xf32, #tpu.memory_space<vmem>>, vector<8x32xf32>,
    } else {
    }
    %c0 = arith.constant 0 : index
    %c0_1 = arith.constant 0 : index
    %3 = vector.load %arg7[%c0, %c0_1] : memref<8x32xf32, #tpu.memory_space<vmem>>, vector<8x32xf32>
    %c0_2 = arith.constant 0 : index
    %c0_3 = arith.constant 0 : index
    %4 = vector.load %arg2[%c0_2, %c0_3] : memref<8x32xf32, #tpu.memory_space<vmem>>, vector<8x32xf32>
    %c0_4 = arith.constant 0 : index
    %c0_5 = arith.constant 0 : index
    %5 = vector.load %arg3[%c0_4, %c0_5] : memref<32x32xf32, #tpu.memory_space<vmem>>, vector<32x32xf32>
    %cst = arith.constant dense<0.000000e+00> : vector<8x32xf32>
    %6 = tpu.matmul %4, %5, %cst {dimension_numbers = #tpu.dot_dimension_numbers<[1], [0], [0], [1], [0, 0, 1, 1], [], []>} : vector<8x32xf32>, vector<32x32xf32>, vector<8x32xf32> -> vector<8x32xf32>
    %7 = arith.addf %3, %6 : vector<8x32xf32>
    %c0_6 = arith.constant 0 : index
    %c0_7 = arith.constant 0 : index
    %8 = vector.load %arg7[%c0_6, %c0_7] : memref<8x32xf32, #tpu.memory_space<vmem>>, vector<8x32xf32>
    tpu.vector_store %arg7[%c0_6, %c0_7], %7 {strides = array<i32>} : memref<8x32xf32, #tpu.memory_space<vmem>>, vector<8x32xf32>,
    %c0_i32_8 = arith.constant 0 : i32
    %9 = arith.cmpi eq, %arg1, %c0_i32_8 : i32
    %10 = arith.extui %9 : i1 to i32
    %c0_i32_9 = arith.constant 0 : i32
    %11 = arith.cmpi ne, %10, %c0_i32_9 : i32
    scf.if %11 {
      %c0_10 = arith.constant 0 : index
      %c0_11 = arith.constant 0 : index
      %12 = vector.load %arg7[%c0_10, %c0_11] : memref<8x32xf32, #tpu.memory_space<vmem>>, vector<8x32xf32>
      %c0_12 = arith.constant 0 : index
      %c0_13 = arith.constant 0 : index
      %13 = vector.load %arg4[%c0_12, %c0_13] : memref<1x32xf32, #tpu.memory_space<vmem>>, vector<1x32xf32>
      %14 = vector.broadcast %13 : vector<1x32xf32> to vector<8x32xf32>
      %15 = arith.addf %12, %14 : vector<8x32xf32>
      %16 = vector.extract_strided_slice %15 {offsets = [0, 0], sizes = [8, 16], strides = [1, 1]} : vector<8x32xf32> to vector<8x16xf32>
      %17 = vector.extract_strided_slice %15 {offsets = [0, 16], sizes = [8, 16], strides = [1, 1]} : vector<8x32xf32> to vector<8x16xf32>
      %cst_14 = arith.constant 5.000000e-01 : f32
      %18 = vector.broadcast %cst_14 : f32 to vector<8x16xf32>
      %19 = arith.mulf %18, %17 : vector<8x16xf32>
      %20 = math.exp %19 : vector<8x16xf32>
      %c0_15 = arith.constant 0 : index
      %c0_16 = arith.constant 0 : index
      %21 = vector.load %arg5[%c0_15, %c0_16] : memref<8x16xf32, #tpu.memory_space<vmem>>, vector<8x16xf32>
      %22 = arith.mulf %21, %20 : vector<8x16xf32>
      %23 = arith.addf %16, %22 : vector<8x16xf32>
      %24 = tpu.concatenate %23, %16, %17 in 1 : vector<8x16xf32>, vector<8x16xf32>, vector<8x16xf32> -> vector<8x48xf32>
      %c0_17 = arith.constant 0 : index
      %c0_18 = arith.constant 0 : index
      %25 = vector.load %arg6[%c0_17, %c0_18] : memref<8x48xf32, #tpu.memory_space<vmem>>, vector<8x48xf32>
      tpu.vector_store %arg6[%c0_17, %c0_18], %24 {strides = array<i32>} : memref<8x48xf32, #tpu.memory_space<vmem>>, vector<8x48xf32>,
    } else {
    }
    return
  }
  func.func @transform_0(%arg0: i32, %arg1: i32) -> (i32, i32) {
    %c0_i32 = arith.constant 0 : i32
    return %arg0, %arg1 : i32, i32
  }
  func.func @transform_1(%arg0: i32, %arg1: i32) -> (i32, i32) {
    %c0_i32 = arith.constant 0 : i32
    %c0_i32_0 = arith.constant 0 : i32
    return %arg1, %c0_i32 : i32, i32
  }
  func.func @transform_2(%arg0: i32, %arg1: i32) -> (i32, i32) {
    %c0_i32 = arith.constant 0 : i32
    %c0_i32_0 = arith.constant 0 : i32
    %c0_i32_1 = arith.constant 0 : i32
    return %c0_i32, %c0_i32_0 : i32, i32
  }
  func.func @transform_3(%arg0: i32, %arg1: i32) -> (i32, i32) {
    %c0_i32 = arith.constant 0 : i32
    %c0_i32_0 = arith.constant 0 : i32
    return %arg0, %c0_i32 : i32, i32
  }
  func.func @transform_4(%arg0: i32, %arg1: i32) -> (i32, i32) {
    %c0_i32 = arith.constant 0 : i32
    %c0_i32_0 = arith.constant 0 : i32
    return %arg0, %c0_i32 : i32, i32
  }
}

</mosaic_0001>

<bundles_post_ra>
// kernel: tpu_custom_call.1
= control target key start
LH: loop header
LB: loop body
LE: loop exit
PB: predicated region body
PF: predicated region fallthrough
CT: control target
= control target key end

     0   :  { %9 = vsyncpa [#allocation4], 0  ;;  %s360_s0 = inlined_call_operand.hbm [shape: f32[8,32], index: 0, kind: input, shape index: {}]   ;;  %s361_s1 = inlined_call_operand.hbm [shape: f32[32,32], index: 1, kind: input, shape index: {}]   ;;  %s362_s2 = inlined_call_operand.vmem [shape: f32[1,32], index: 2, kind: input, shape index: {}]   ;;  %s363_s3 = inlined_call_operand.hbm [shape: f32[8,16], index: 3, kind: input, shape index: {}]   ;;  %s364_s4 = inlined_call_operand.hbm [shape: f32[8,48], index: 4, kind: output, shape index: {}]  }
   0x1   :  { %10 = vsyncpa [#allocation7], 0 }
   0x2   :  { %11 = vsyncpa [#allocation5], 0  ;;  %s306_s15 = smov [#allocation6]  }
   0x3   :  { %s27_s16 = sshll.u32 %s306_s15, 4  ;;  %s28_s16 = int_to_ptr.vmem [resolvable:$true] %s27_s16 }
   0x4   :  { %s228_s17 = scalar_lea.vmem %s28_s16, 512  ;;  %p233_p1 = scmp.lt.s32.totalorder %s28_s16, %s28_s16 }
   0x5   :  { %p229_p0 = scmp.ne.s32.totalorder %s28_s16, %s228_s17  ;;  %p234_p2 = scmp.lt.s32.totalorder %s228_s17, %s228_s17 }
   0x7   :  { %p235_p3 = por %p234_p2, %p233_p1 }
   0x9   :  { %p236_p4 = pnand %p235_p3, %p229_p0 }
   0xb   :  { %239 = shalt.err (!%p236_p4)
}
   0xc   :  { %s307_s18 = smov 128   ;;  %s308_s19 = smov 8  }
   0xd   :  { %33 = dma.hbm_to_vmem [thread:$0]  %s361_s1, 512, %s28_s16, [#allocation7], %s307_s18, %s307_s18, %s308_s19  }
   0xe   :  { %s309_s22 = smov [#allocation3]   ;;  %s310_s24 = smov [#allocation8]  }
   0xf   :  { %s18_s23 = sshll.u32 %s309_s22, 4  ;;  %s42_s25 = sshll.u32 %s310_s24, 4  ;;  %s19_s23 = int_to_ptr.vmem [resolvable:$true] %s18_s23  ;;  %s43_s25 = int_to_ptr.vmem [resolvable:$true] %s42_s25 }
  0x10   :  { %s248_s26 = scalar_lea.vmem %s19_s23, 128  ;;  %p253_p6 = scmp.lt.s32.totalorder %s19_s23, %s19_s23 }
  0x11   :  { %p249_p5 = scmp.ne.s32.totalorder %s19_s23, %s248_s26  ;;  %p254_p7 = scmp.lt.s32.totalorder %s248_s26, %s248_s26 }
  0x13   :  { %p255_p8 = por %p254_p7, %p253_p6 }
  0x15   :  { %p256_p9 = pnand %p255_p8, %p249_p5 }
  0x17   :  { %259 = shalt.err (!%p256_p9)
}
  0x18   :  { %21 = dma.hbm_to_vmem [thread:$0]  %s360_s0, 128, %s19_s23, [#allocation4]  }
  0x19   :  { %s268_s29 = scalar_lea.vmem %s43_s25, 128  ;;  %p273_p11 = scmp.lt.s32.totalorder %s43_s25, %s43_s25 }
  0x1a   :  { %p269_p10 = scmp.ne.s32.totalorder %s43_s25, %s268_s29  ;;  %p274_p12 = scmp.lt.s32.totalorder %s268_s29, %s268_s29 }
  0x1c   :  { %p275_p13 = por %p274_p12, %p273_p11 }
  0x1e   :  { %p276_p0 = pnand %p275_p13, %p269_p10 }
  0x20   :  { %279 = shalt.err (!%p276_p0)
}
  0x21   :  { %45 = dma.hbm_to_vmem [thread:$0]  %s363_s3, 128, %s43_s25, [#allocation7]  }
  0x22   :  { %300 = dma.done.wait [#allocation4], 128  }
  0x23   :  { %301 = vsyncadd [#allocation4], 4294967168 }
  0x24   :  { %302 = dma.done.wait [#allocation7], 640  }
  0x25   :  { %303 = vsyncadd [#allocation7], 4294966656  ;;  %vm59_vm0 = vcmask 261120   ;;  %v311_v0 = vmov 0.0   ;;  %vm312_vm1 = vmmov 0   ;;  %v66_v1 = vld [vmem:[#allocation6 + $0x18] sm:$0xff] }
  0x26   :  { %197 = vmatprep.subr.mxu0 %v311_v0  ;;  %205 = vmatprep.mubr.msk.f32.mxu0 %vm312_vm1, %v311_v0  ;;  %60 = vst.msk [vmem:[#allocation2] sm:$0xff] %vm59_vm0, %v311_v0  ;;  %v65_v2 = vld [vmem:[#allocation6 + $0x10] sm:$0xff]  ;;  %v64_v3 = vld [vmem:[#allocation6 + $0x8] sm:$0xff]  ;;  %v63_v4 = vld [vmem:[#allocation6] sm:$0xff]  ;;  %s313_s5 = smov 112   ;;  %s314_s6 = smov 16  }
  0x27   :  { %198 = vmatpush3.msra.mxu0 %v66_v1  ;;  %v62_v5 = vld [vmem:[#allocation3] sm:$0xff]  ;;  %v191_v10 = vld [vmem:[%s362_s2] ss:$0 sm:$0xff]  ;;  %v158_v16 = vld [vmem:[#allocation8] sm:$0xff]  ;;  %vm169_vm2 = vcmask 130048   ;;  %s315_s7 = smov [#allocation9]  }
  0x28   :  { %199 = vmatprep.subr.mxu0 %v311_v0  ;;  %s180_s8 = sshll.u32 %s315_s7, 4  ;;  %vm172_vm3 = vcmask 392192   ;;  %s181_s8 = int_to_ptr.vmem [resolvable:$true] %s180_s8 }
  0x29   :  { %200 = vmatpush3.msra.mxu0 %v65_v2  ;;  %s280_s2 = scalar_lea.vmem %s181_s8, 128  ;;  %p285_p2 = scmp.lt.s32.totalorder %s181_s8, %s181_s8 }
  0x2a   :  { %201 = vmatprep.subr.mxu0 %v311_v0  ;;  %p281_p1 = scmp.ne.s32.totalorder %s181_s8, %s280_s2  ;;  %p286_p3 = scmp.lt.s32.totalorder %s280_s2, %s280_s2 }
  0x2b   :  { %202 = vmatpush3.msra.mxu0 %v64_v3 }
  0x2c   :  { %203 = vmatprep.subr.mxu0 %v311_v0  ;;  %p287_p4 = por %p286_p3, %p285_p2 }
  0x2d   :  { %204 = vmatpush3.msra.mxu0 %v63_v4  ;;  %v61_v6 = vld [vmem:[#allocation2] sm:$0xff] }
  0x2e   :  { %206 = vmatmul.mubr.msk.f32.vlgmr.msra.gmra.mxu0 %vm59_vm0, %v62_v5  ;;  %p288_p5 = pnand %p287_p4, %p281_p1 }
  0xee   :  { %v137_v7 = vpop.f32.mrf.mxu0 }
  0xef   :  { %v141_v8 = vadd.f32 %v137_v7, %v61_v6 }
  0xf0   :  { %v207_v9 = vpop.f32.mrf.mxu0 }
  0xf1   :  { %142 = vst.msk [vmem:[#allocation2] sm:$0xff] %vm59_vm0, %v141_v8 }
  0xf8   :  { %v146_v11 = vld [vmem:[#allocation2] sm:$0xff] }
  0xf9   :  { %v154_v12 = vadd.f32 %v191_v10, %v146_v11 }
  0xfb   :  { %v155_v13 = vmul.f32 0.5, %v154_v12 }
  0xfd   :  { %v156_v14 = vmul.f32 1.442695, %v155_v13 }
  0xff   :  { %218 = vpow2.f32 %v156_v14 }
 0x10c   :  { %v219_v15 = vpop.eup %218 }
 0x10d   :  { %160 = vrot.lane.b32.xlu0 %v219_v15, %s313_s5 }
 0x111   :  { %166 = vrot.lane.b32.xlu0 %v154_v12, %s314_s6 }
 0x17f   :  { %v161_v17 = vpop.permute.xlu0 %160 }
 0x180   :  { %v163_v18 = vmul.f32 %v161_v17, %v158_v16 }
 0x182   :  { %v164_v19 = vadd.f32 %v163_v18, %v154_v12 }
 0x183   :  { %v167_v20 = vpop.permute.xlu0 %166 }
 0x184   :  { %v170_v21 = vsel %vm169_vm2, %v164_v19, %v167_v20 }
 0x185   :  { %v171_v22 = vsel %vm59_vm0, %v170_v21, %v167_v20 }
 0x186   :  { %173 = vst.msk [vmem:[#allocation9] sm:$0xff] %vm172_vm3, %v171_v22 }
 0x187   :  { %291 = shalt.err (!%p288_p5)
}
 0x188   :  { %183 = dma.vmem_to_hbm [thread:$0]  %s181_s8, 128, %s364_s4, [#allocation5]  }
 0x189   :  { %304 = dma.done.wait [#allocation5], 128  }
 0x18a   :  { %305 = vsyncadd [#allocation5], 4294967168 }
 0x18b   :  { %187 = vsyncpa [#allocation4], 1 }
 0x18c   :  { %188 = vsyncpa [#allocation7], 1 }
 0x18d   :  { %189 = vsyncpa [#allocation5], 1 }

</bundles_post_ra>
